<compile_context>
chip_gen: v5e
topology: v5e:2x2
jax: 0.10.0
libtpu: 0.0.40
codegen_flags: <defaults>
</compile_context>

<pallas_src>
import math

import jax
import jax.numpy as jnp
from jax.experimental import pallas as pl
from jax.experimental.pallas import tpu as pltpu


def _time_emb_kernel(t_ref, freq_ref, phase_ref, o_ref):
    # t_ref:     (TB, 1)   f32 timesteps for this batch tile
    # freq_ref:  (1, dim)  f32 = [freqs | freqs]      (grid-invariant block)
    # phase_ref: (1, dim)  f32 = [0 ... 0 | pi/2 ...] (grid-invariant block)
    # o_ref:     (TB, dim) output
    #
    # cos(x) == sin(x + pi/2): one transcendental stream and a single
    # full-lane-width unmasked store instead of two half-width masked ones.
    emb = t_ref[...] * freq_ref[...] + phase_ref[...]
    o_ref[...] = jnp.sin(emb).astype(o_ref.dtype)


def _round_up(x: int, m: int) -> int:
    return ((x + m - 1) // m) * m


def _pick_tb(B: int, dim: int) -> int:
    # VMEM budget: double-buffered (tb, dim) f32 output + (tb, 1) t block
    # (lane-padded to (tb, 128) in VMEM). Keep well under v5e's 16 MiB default
    # scoped VMEM; v6e/v7x (32 MiB) have extra headroom.
    budget = 12 * 1024 * 1024
    per_row = 2 * (dim + 128) * 4
    cap = min(2048, max(8, (budget // per_row) // 8 * 8))
    # Aim for >= 4 grid steps when B allows it, so v7x's two TensorCores both
    # get work via the "parallel" batch axis (no-op on v5e/v6e).
    target = max(8, _round_up(pl.cdiv(B, 4), 8))
    return min(cap, target)


def _jnp_time_embedding(t: jax.Array, dim: int, out_dtype=jnp.float32) -> jax.Array:
    """Plain-jnp implementation (PyTorch semantics). Used as fallback + reference."""
    half = dim // 2
    scale = math.log(10000.0) / (half - 1)
    freqs = jnp.exp(jnp.arange(half, dtype=jnp.float32) * -scale)
    emb = t.astype(jnp.float32)[:, None] * freqs[None, :]
    out = jnp.concatenate([jnp.sin(emb), jnp.cos(emb)], axis=-1)[:, None, :]
    return out.astype(out_dtype)


def sinusoidal_time_embedding(
    t: jax.Array,
    dim: int,
    *,
    tb: int | None = None,
    out_dtype=jnp.float32,
    use_pallas: bool | None = None,
) -> jax.Array:
    """Returns (B, 1, dim) embedding matching the PyTorch module."""
    assert dim % 2 == 0 and dim >= 4, "dim must be even and >= 4 (half-1 divides)"
    B = t.shape[0]
    half = dim // 2

    # For dim < 128 the output store is lane-masked and an XLA-fused sin/cos in
    # the consumer beats any standalone Pallas call — fall back to plain jnp.
    if use_pallas is None:
        use_pallas = dim >= 128
    if not use_pallas:
        return _jnp_time_embedding(t, dim, out_dtype)

    # Frequency / phase tables, built with the SAME f32 ops as the reference
    # (bit-identical freqs), baked outside the kernel as tiny resident blocks.
    scale = math.log(10000.0) / (half - 1)
    freqs = jnp.exp(jnp.arange(half, dtype=jnp.float32) * -scale)        # (half,)
    freqs_full = jnp.concatenate([freqs, freqs]).reshape(1, dim)          # (1, dim)
    phase = jnp.concatenate(
        [jnp.zeros((half,), jnp.float32),
         jnp.full((half,), math.pi / 2, dtype=jnp.float32)]
    ).reshape(1, dim)                                                     # (1, dim)

    if tb is None:
        tb = _pick_tb(B, dim)
    else:
        tb = max(8, (tb // 8) * 8)

    t2d = t.astype(jnp.float32).reshape(B, 1)
    grid = (pl.cdiv(B, tb),)  # non-divisible last block: bounded writeback, no pad

    out_bytes = B * dim * jnp.dtype(out_dtype).itemsize
    out = pl.pallas_call(
        _time_emb_kernel,
        out_shape=jax.ShapeDtypeStruct((B, dim), out_dtype),
        grid=grid,
        in_specs=[
            pl.BlockSpec((tb, 1), lambda i: (i, 0)),    # timesteps, tiled over B
            pl.BlockSpec((1, dim), lambda i: (0, 0)),   # freqs table, resident
            pl.BlockSpec((1, dim), lambda i: (0, 0)),   # phase table, resident
        ],
        out_specs=pl.BlockSpec((tb, dim), lambda i: (i, 0)),
        compiler_params=pltpu.CompilerParams(
            dimension_semantics=("parallel",),          # megacore shard on v7x
        ),
        cost_estimate=pl.CostEstimate(
            flops=2 * B * dim,            # fused mul + add per output element
            transcendentals=B * dim,      # one sin per output element
            bytes_accessed=out_bytes + (B + 2 * dim) * 4,
        ),
    )(t2d, freqs_full, phase)

    # unsqueeze(1) -> (B, 1, dim); pure metadata reshape.
    return out[:, None, :]


if __name__ == "__main__":
    key = jax.random.PRNGKey(0)
    k0, k1 = jax.random.split(key)

    # Case 1: lane-dense dim (multiple of 128), small batch, single grid step.
    B, dim = 8, 256
    t = jax.random.uniform(k0, (B,), dtype=jnp.float32, minval=0.0, maxval=100.0)
    out = jax.block_until_ready(sinusoidal_time_embedding(t, dim))
    ref = _jnp_time_embedding(t, dim)
    assert out.shape == (B, 1, dim), out.shape
    assert jnp.allclose(out, ref, atol=1e-4, rtol=1e-4), "mismatch vs reference (case 1)"

    # Case 2: batch not a multiple of the tile — exercises the non-divisible
    # grid / bounded-writeback path (no padding, no post-slice).
    B2, dim2 = 37, 128
    t2 = jax.random.uniform(k1, (B2,), dtype=jnp.float32, minval=0.0, maxval=100.0)
    out2 = jax.block_until_ready(sinusoidal_time_embedding(t2, dim2, tb=8))
    ref2 = _jnp_time_embedding(t2, dim2)
    assert out2.shape == (B2, 1, dim2), out2.shape
    assert jnp.allclose(out2, ref2, atol=1e-4, rtol=1e-4), "mismatch vs reference (case 2)"

    print("KERNEL_OK")
</pallas_src>

<mosaic_0001>
module attributes {stable_mosaic.version = 11 : i64} {
  func.func @_time_emb_kernel(%arg0: i32, %arg1: memref<8x1xf32, #tpu.memory_space<vmem>>, %arg2: memref<1x256xf32, #tpu.memory_space<vmem>>, %arg3: memref<1x256xf32, #tpu.memory_space<vmem>>, %arg4: memref<8x256xf32, #tpu.memory_space<vmem>>) attributes {dimension_semantics = [#tpu.dimension_semantics<parallel>], iteration_bounds = array<i64: 1>, scalar_prefetch = 0 : i64, scratch_operands = 0 : i64, tpu.core_type = #tpu.core_type<tc>, window_params = [{transform_indices = @transform_0, window_bounds = array<i64: 8, 1>}, {pipeline_mode = #tpu.pipeline_mode<synchronous>, transform_indices = @transform_1, window_bounds = array<i64: 1, 256>}, {pipeline_mode = #tpu.pipeline_mode<synchronous>, transform_indices = @transform_2, window_bounds = array<i64: 1, 256>}, {transform_indices = @transform_3, window_bounds = array<i64: 8, 256>}]} {
    %c0 = arith.constant 0 : index
    %c0_0 = arith.constant 0 : index
    %0 = vector.load %arg1[%c0, %c0_0] : memref<8x1xf32, #tpu.memory_space<vmem>>, vector<8x1xf32>
    %c0_1 = arith.constant 0 : index
    %c0_2 = arith.constant 0 : index
    %1 = vector.load %arg2[%c0_1, %c0_2] : memref<1x256xf32, #tpu.memory_space<vmem>>, vector<1x256xf32>
    %2 = vector.broadcast %0 : vector<8x1xf32> to vector<8x256xf32>
    %3 = vector.broadcast %1 : vector<1x256xf32> to vector<8x256xf32>
    %4 = arith.mulf %2, %3 : vector<8x256xf32>
    %c0_3 = arith.constant 0 : index
    %c0_4 = arith.constant 0 : index
    %5 = vector.load %arg3[%c0_3, %c0_4] : memref<1x256xf32, #tpu.memory_space<vmem>>, vector<1x256xf32>
    %6 = vector.broadcast %5 : vector<1x256xf32> to vector<8x256xf32>
    %7 = arith.addf %4, %6 : vector<8x256xf32>
    %8 = math.sin %7 : vector<8x256xf32>
    %c0_5 = arith.constant 0 : index
    %c0_6 = arith.constant 0 : index
    %9 = vector.load %arg4[%c0_5, %c0_6] : memref<8x256xf32, #tpu.memory_space<vmem>>, vector<8x256xf32>
    tpu.vector_store %arg4[%c0_5, %c0_6], %8 {strides = array<i32>} : memref<8x256xf32, #tpu.memory_space<vmem>>, vector<8x256xf32>,
    return
  }
  func.func @transform_0(%arg0: i32) -> (i32, i32) {
    %c0_i32 = arith.constant 0 : i32
    %c0_i32_0 = arith.constant 0 : i32
    return %arg0, %c0_i32 : i32, i32
  }
  func.func @transform_1(%arg0: i32) -> (i32, i32) {
    %c0_i32 = arith.constant 0 : i32
    %c0_i32_0 = arith.constant 0 : i32
    %c0_i32_1 = arith.constant 0 : i32
    return %c0_i32, %c0_i32_0 : i32, i32
  }
  func.func @transform_2(%arg0: i32) -> (i32, i32) {
    %c0_i32 = arith.constant 0 : i32
    %c0_i32_0 = arith.constant 0 : i32
    %c0_i32_1 = arith.constant 0 : i32
    return %c0_i32, %c0_i32_0 : i32, i32
  }
  func.func @transform_3(%arg0: i32) -> (i32, i32) {
    %c0_i32 = arith.constant 0 : i32
    %c0_i32_0 = arith.constant 0 : i32
    return %arg0, %c0_i32 : i32, i32
  }
}

</mosaic_0001>

<bundles_post_ra>
// kernel: tpu_custom_call.1
= control target key start
LH: loop header
LB: loop body
LE: loop exit
PB: predicated region body
PF: predicated region fallthrough
CT: control target
= control target key end

     0   :  { %s629_s0 = inlined_call_operand.vmem [shape: f32[8,1], index: 0, kind: input, shape index: {}]   ;;  %s630_s1 = inlined_call_operand.vmem [shape: f32[1,256], index: 1, kind: input, shape index: {}]   ;;  %s631_s2 = inlined_call_operand.vmem [shape: f32[1,256], index: 2, kind: input, shape index: {}]   ;;  %s632_s3 = inlined_call_operand.hbm [shape: f32[8,256], index: 3, kind: output, shape index: {}]  }
   0x1   :  { %v15_v0 = vld [vmem:[%s629_s0] sm:$0xff] }
   0x2   :  { %8 = vsyncpa [#allocation3], 0  ;;  %v406_v1 = vmov 0   ;;  %v16_v2 = vld [vmem:[%s630_s1] sm:$0x3]  ;;  %s413_s0 = smov [#allocation2]  }
   0x3   :  { %379 = vset.pattern.permute.xlu0 %v406_v1  ;;  %v29_v3 = vld [vmem:[%s631_s2] sm:$0x3]  ;;  %v23_v4 = vperm.slane %v16_v2, 0  ;;  %v24_v5 = vperm.slane %v16_v2, 1  ;;  %v407_v36 = vmov 683565275  }
   0x4   :  { %19 = vperm.xlu0 %379, %v15_v0   ;;  %v31_v6 = vperm.slane %v29_v3, 0  ;;  %v32_v7 = vperm.slane %v29_v3, 1  ;;  %v408_v38 = vmov 2475754826   ;;  %v409_v42 = vmov 2131351028  }
   0x5   :  { %v410_v45 = vmov 2102212464   ;;  %v411_v48 = vmov 920167782   ;;  %v412_v51 = vmov 1326507024  }
   0x6   :  { %s354_s1 = sshll.u32 %s413_s0, 4  ;;  %s356_s19 = sshll.u32 %s632_s3, 4  ;;  %s355_s1 = int_to_ptr.vmem [resolvable:$true] %s354_s1  ;;  %s357_s19 = int_to_ptr.hbm [resolvable:$true] %s356_s19 }
  0x76   :  { %v20_v8 = vpop.permute.xlu0 %19 }
  0x77   :  { %v27_v9 = vmul.f32 %v23_v4, %v20_v8  ;;  %v28_v10 = vmul.f32 %v24_v5, %v20_v8 }
  0x79   :  { %v444_v11 = vadd.f32 %v31_v6, %v27_v9  ;;  %v446_v12 = vadd.f32 %v32_v7, %v28_v10 }
  0x7b   :  { %v37_v13 = vand.u32 2147483647, %v444_v11  ;;  %v40_v14 = vand.u32 2139095040, %v444_v11  ;;  %v192_v15 = vand.u32 2147483647, %v446_v12  ;;  %v195_v16 = vand.u32 2139095040, %v446_v12 }
  0x7d   :  { %v41_v17 = vshrl.u32 %v40_v14, 23  ;;  %v44_v18 = vand.u32 8388607, %v37_v13  ;;  %v196_v19 = vshrl.u32 %v195_v16, 23  ;;  %v199_v22 = vand.u32 8388607, %v192_v15 }
  0x7f   :  { %v365_v20 = vadd.s32 4294967169, %v41_v17  ;;  %v45_v21 = vor.u32 8388608, %v44_v18  ;;  %v368_v23 = vadd.s32 4294967169, %v196_v19  ;;  %v200_v27 = vor.u32 8388608, %v199_v22 }
  0x81   :  { %v47_v24 = vadd.s32 1, %v365_v20  ;;  %v202_v25 = vadd.s32 1, %v368_v23  ;;  %v456_v26 = vshll.u32 %v45_v21, 8  ;;  %v463_v34 = vshll.u32 %v200_v27, 8 }
  0x83   :  { %vm48_vm0 = vcmp.gt.s32.totalorder %v47_v24, 0  ;;  %vm203_vm1 = vcmp.gt.s32.totalorder %v202_v25, 0  ;;  %v459_v32 = vand.u32 65535, %v456_v26  ;;  %v87_v40 = vshrl.u32 %v456_v26, 16 }
  0x84   :  { %v49_v28 = vsel %vm48_vm0, %v47_v24, 0  ;;  %v204_v30 = vsel %vm203_vm1, %v202_v25, 0 }
  0x85   :  { %v51_v29 = vand.u32 31, %v49_v28  ;;  %v461_v33 = vand.u32 31, %v204_v30  ;;  %v465_v35 = vshrl.u32 %v49_v28, 5  ;;  %v503_v20 = vshrl.u32 %v204_v30, 5 }
  0x87   :  { %v52_v31 = vsub.s32 32, %v51_v29  ;;  %v54_v37 = vshll.u32 %v407_v36, %v51_v29  ;;  %v57_v39 = vshll.u32 %v408_v38, %v51_v29  ;;  %v60_v44 = vshll.u32 %v409_v42, %v51_v29 }
  0x88   :  { %v63_v47 = vshll.u32 %v410_v45, %v51_v29  ;;  %v66_v50 = vshll.u32 %v411_v48, %v51_v29  ;;  %v475_v56 = vsub.s32 32, %v461_v33  ;;  %vm69_vm2 = vcmp.lt.s32.totalorder %v465_v35, 1 }
  0x89   :  { %v55_v41 = vshrl.u32 %v408_v38, %v52_v31  ;;  %v58_v43 = vshrl.u32 %v409_v42, %v52_v31  ;;  %v61_v46 = vshrl.u32 %v410_v45, %v52_v31  ;;  %v64_v49 = vshrl.u32 %v411_v48, %v52_v31 }
  0x8a   :  { %v67_v52 = vshrl.u32 %v412_v51, %v52_v31  ;;  %vm70_vm3 = vcmp.lt.s32.totalorder %v465_v35, 2  ;;  %v53_v59 = vshrl.u32 %v407_v36, %v52_v31  ;;  %vm72_vm4 = vcmp.lt.s32.totalorder %v465_v35, 4 }
  0x8b   :  { %v56_v53 = vor.u32 %v55_v41, %v54_v37  ;;  %v59_v54 = vor.u32 %v58_v43, %v57_v39  ;;  %v62_v55 = vor.u32 %v61_v46, %v60_v44  ;;  %v65_v57 = vor.u32 %v64_v49, %v63_v47 }
  0x8c   :  { %v68_v58 = vor.u32 %v67_v52, %v66_v50  ;;  %vm71_vm5 = vcmp.lt.s32.totalorder %v465_v35, 3  ;;  %v209_v0 = vshll.u32 %v407_v36, %v461_v33  ;;  %v210_v5 = vshrl.u32 %v408_v38, %v475_v56 }
  0x8d   :  { %v77_v60 = vsel %vm69_vm2, %v56_v53, %v59_v54  ;;  %v81_v61 = vsel %vm69_vm2, %v59_v54, %v62_v55  ;;  %v78_v62 = vsel %vm72_vm4, %v65_v57, 920167782  ;;  %v74_v2 = vsel %vm72_vm4, %v62_v55, 2102212464 }
  0x8e   :  { %v82_v63 = vsel %vm72_vm4, %v68_v58, 1326507024  ;;  %v79_v3 = vsel %vm71_vm5, %v62_v55, %v78_v62  ;;  %v212_v8 = vshll.u32 %v408_v38, %v461_v33  ;;  %v213_v9 = vshrl.u32 %v409_v42, %v475_v56 }
  0x8f   :  { %v83_v4 = vsel %vm71_vm5, %v65_v57, %v82_v63  ;;  %v80_v6 = vsel %vm70_vm3, %v77_v60, %v79_v3  ;;  %v73_v18 = vsel %vm69_vm2, %v53_v59, %v56_v53  ;;  %v75_v19 = vsel %vm71_vm5, %v59_v54, %v74_v2 }
  0x90   :  { %v84_v7 = vsel %vm70_vm3, %v81_v61, %v83_v4  ;;  %v110_v16 = vand.u32 65535, %v80_v6  ;;  %v111_v17 = vshrl.u32 %v80_v6, 16  ;;  %v505_v21 = vor.u32 %v210_v5, %v209_v0 }
  0x91   :  { %v88_v10 = vand.u32 65535, %v84_v7  ;;  %v89_v14 = vshrl.u32 %v84_v7, 16  ;;  %v508_v24 = vor.u32 %v213_v9, %v212_v8  ;;  %v216_v25 = vshrl.u32 %v410_v45, %v475_v56 }
  0x92   :  { %v113_v28 = vmul.u32 %v111_v17, %v459_v32  ;;  %v114_v29 = vmul.u32 %v110_v16, %v87_v40  ;;  %v215_v31 = vshll.u32 %v409_v42, %v461_v33  ;;  %v112_v38 = vmul.u32 %v110_v16, %v459_v32 }
  0x93   :  { %v91_v22 = vmul.u32 %v89_v14, %v459_v32  ;;  %v92_v23 = vmul.u32 %v88_v10, %v87_v40  ;;  %v90_v27 = vmul.u32 %v88_v10, %v459_v32  ;;  %v93_v37 = vmul.u32 %v89_v14, %v87_v40 }
  0x94   :  { %v115_v39 = vmul.u32 %v111_v17, %v87_v40  ;;  %v116_v46 = vshll.u32 %v113_v28, 16  ;;  %v118_v49 = vshll.u32 %v114_v29, 16  ;;  %v516_v50 = vor.u32 %v216_v25, %v215_v31 }
  0x95   :  { %v94_v30 = vshll.u32 %v91_v22, 16  ;;  %v95_v41 = vshrl.u32 %v91_v22, 16  ;;  %v96_v43 = vshll.u32 %v92_v23, 16  ;;  %v97_v44 = vshrl.u32 %v92_v23, 16 }
  0x96   :  { %vm120_vm7 = vc.u32 %v112_v38, %v116_v46  ;;  %v122_v53 = vadd.s32 %v116_v46, %v112_v38  ;;  %v219_v42 = vshrl.u32 %v411_v48, %v475_v56  ;;  %v218_v40 = vshll.u32 %v410_v45, %v461_v33 }
  0x97   :  { %vm98_vm6 = vc.u32 %v90_v27, %v94_v30  ;;  %v100_v47 = vadd.s32 %v94_v30, %v90_v27  ;;  %v121_v32 = vsel %vm120_vm7, 1, %v406_v1  ;;  %v221_v58 = vshll.u32 %v411_v48, %v461_v33 }
  0x98   :  { %v99_v52 = vsel %vm98_vm6, 1, %v406_v1  ;;  %v123_v57 = vadd.s32 %v121_v32, %v115_v39  ;;  %vm124_vm9 = vc.u32 %v122_v53, %v118_v49  ;;  %v220_v61 = vor.u32 %v219_v42, %v218_v40 }
  0x99   :  { %v101_v54 = vadd.s32 %v99_v52, %v93_v37  ;;  %vm102_vm8 = vc.u32 %v100_v47, %v96_v43  ;;  %v125_v60 = vsel %vm124_vm9, 1, %v406_v1  ;;  %v222_v62 = vshrl.u32 %v412_v51, %v475_v56 }
  0x9a   :  { %v103_v55 = vsel %vm102_vm8, 1, %v406_v1  ;;  %v117_v63 = vshrl.u32 %v113_v28, 16  ;;  %v119_v0 = vshrl.u32 %v114_v29, 16  ;;  %v530_v2 = vadd.s32 %v122_v53, %v118_v49 }
  0x9b   :  { %v105_v59 = vadd.s32 %v103_v55, %v101_v54  ;;  %v127_v3 = vadd.s32 %v125_v60, %v123_v57  ;;  %v223_v4 = vor.u32 %v222_v62, %v221_v58  ;;  %vm224_vm10 = vcmp.lt.s32.totalorder %v503_v20, 1 }
  0x9c   :  { %vm227_vm11 = vcmp.lt.s32.totalorder %v503_v20, 4  ;;  %vm226_vm12 = vcmp.lt.s32.totalorder %v503_v20, 3  ;;  %v232_v33 = vsel %vm224_vm10, %v505_v21, %v508_v24  ;;  %vm225_vm13 = vcmp.lt.s32.totalorder %v503_v20, 2 }
  0x9d   :  { %v106_v45 = vadd.s32 %v105_v59, %v95_v41  ;;  %v128_v5 = vadd.s32 %v127_v3, %v117_v63  ;;  %v233_v48 = vsel %vm227_vm11, %v220_v61, 920167782  ;;  %v236_v7 = vsel %vm224_vm10, %v508_v24, %v516_v50 }
  0x9e   :  { %v234_v6 = vsel %vm226_vm12, %v516_v50, %v233_v48  ;;  %v76_v8 = vsel %vm70_vm3, %v73_v18, %v75_v19  ;;  %v237_v14 = vsel %vm227_vm11, %v223_v4, 1326507024  ;;  %v241_v17 = vand.u32 65535, %v463_v34 }
  0x9f   :  { %v541_v51 = vadd.s32 %v106_v45, %v97_v44  ;;  %v129_v9 = vadd.s32 %v128_v5, %v119_v0  ;;  %v235_v10 = vsel %vm225_vm13, %v232_v33, %v234_v6  ;;  %v238_v16 = vsel %vm226_vm12, %v220_v61, %v237_v14 }
  0xa0   :  { %v265_v22 = vand.u32 65535, %v235_v10  ;;  %v239_v35 = vsel %vm225_vm13, %v236_v7, %v238_v16  ;;  %v242_v18 = vshrl.u32 %v463_v34, 16  ;;  %v266_v19 = vshrl.u32 %v235_v10, 16 }
  0xa1   :  { %vm132_vm14 = vc.u32 %v541_v51, %v530_v2  ;;  %v133_v23 = vadd.s32 1, %v129_v9  ;;  %v130_v25 = vmul.u32 %v456_v26, %v76_v8  ;;  %v243_v27 = vand.u32 65535, %v239_v35 }
  0xa2   :  { %v244_v28 = vshrl.u32 %v239_v35, 16  ;;  %v268_v31 = vmul.u32 %v266_v19, %v241_v17  ;;  %v269_v37 = vmul.u32 %v265_v22, %v242_v18  ;;  %v267_v41 = vmul.u32 %v265_v22, %v241_v17 }
  0xa3   :  { %v134_v29 = vsel %vm132_vm14, %v133_v23, %v129_v9  ;;  %v247_v39 = vmul.u32 %v243_v27, %v242_v18  ;;  %v270_v43 = vmul.u32 %v266_v19, %v242_v18  ;;  %v245_v47 = vmul.u32 %v243_v27, %v241_v17 }
  0xa4   :  { %v135_v30 = vadd.s32 %v134_v29, %v130_v25  ;;  %v246_v38 = vmul.u32 %v244_v28, %v241_v17  ;;  %v271_v44 = vshll.u32 %v268_v31, 16  ;;  %v248_v49 = vmul.u32 %v244_v28, %v242_v18 }
  0xa5   :  { %v251_v53 = vshll.u32 %v247_v39, 16  ;;  %v273_v42 = vshll.u32 %v269_v37, 16  ;;  %v229_v59 = vsel %vm227_vm11, %v516_v50, 2102212464  ;;  %v208_v61 = vshrl.u32 %v407_v36, %v475_v56 }
  0xa6   :  { %v136_v46 = vadd.s32 536870912, %v135_v30  ;;  %v249_v52 = vshll.u32 %v246_v38, 16  ;;  %vm275_vm15 = vc.u32 %v267_v41, %v271_v44  ;;  %v277_v54 = vadd.s32 %v271_v44, %v267_v41 }
  0xa7   :  { %v276_v40 = vsel %vm275_vm15, 1, %v406_v1  ;;  %v250_v3 = vshrl.u32 %v246_v38, 16  ;;  %v228_v5 = vsel %vm224_vm10, %v208_v61, %v505_v21  ;;  %v230_v50 = vsel %vm226_vm12, %v508_v24, %v229_v59 }
  0xa8   :  { %v566_v26 = vshrl.u32 %v136_v46, 30  ;;  %vm253_vm0 = vc.u32 %v245_v47, %v249_v52  ;;  %v255_v32 = vadd.s32 %v249_v52, %v245_v47  ;;  %v278_v57 = vadd.s32 %v276_v40, %v270_v43 }
  0xa9   :  { %v254_v55 = vsel %vm253_vm0, 1, %v406_v1  ;;  %vm279_vm1 = vc.u32 %v277_v54, %v273_v42  ;;  %v272_v33 = vshrl.u32 %v268_v31, 16  ;;  %v252_v36 = vshrl.u32 %v247_v39, 16 }
  0xaa   :  { %v138_v58 = vshll.u32 %v566_v26, 30  ;;  %v256_v60 = vadd.s32 %v254_v55, %v248_v49  ;;  %vm257_vm2 = vc.u32 %v255_v32, %v251_v53  ;;  %v280_v63 = vsel %vm279_vm1, 1, %v406_v1 }
  0xab   :  { %v258_v62 = vsel %vm257_vm2, 1, %v406_v1  ;;  %v282_v4 = vadd.s32 %v280_v63, %v278_v57  ;;  %v274_v6 = vshrl.u32 %v269_v37, 16  ;;  %v231_v10 = vsel %vm225_vm13, %v228_v5, %v230_v50 }
  0xac   :  { %v139_v0 = vsub.s32 %v135_v30, %v138_v58  ;;  %v260_v45 = vadd.s32 %v258_v62, %v256_v60  ;;  %v281_v14 = vadd.s32 %v277_v54, %v273_v42  ;;  %v285_v24 = vmul.u32 %v463_v34, %v231_v10 }
  0xad   :  { %v283_v7 = vadd.s32 %v282_v4, %v272_v33  ;;  %v131_v18 = vadd.s32 %v530_v2, %v541_v51  ;;  %vm39_vm7 = vcmp.lt.s32.totalorder %v444_v11, 0  ;;  %vm595_vm8 = vcmp.le.f32.partialorder %v37_v13, 0.7853982 }
  0xae   :  { %vm140_vm3 = vcmp.lt.s32.totalorder %v139_v0, 0  ;;  %v141_v48 = vsub.s32 0, %v139_v0  ;;  %v261_v56 = vadd.s32 %v260_v45, %v250_v3  ;;  %v161_v42 = vsub.s32 4, %v566_v26 }
  0xaf   :  { %v284_v16 = vadd.s32 %v283_v7, %v274_v6  ;;  %vm608_vm10 = vcmp.le.f32.partialorder %v192_v15, 0.7853982  ;;  %vm194_vm11 = vcmp.lt.s32.totalorder %v446_v12, 0  ;;  %vm180_vm15 = vweird.f32 %v444_v11 }
  0xb0   :  { %v142_v1 = vsel %vm140_vm3, %v141_v48, %v139_v0  ;;  %v262_v8 = vadd.s32 %v261_v56, %v252_v36  ;;  %v162_v13 = vsel %vm39_vm7, %v161_v42, %v566_v26  ;;  %vm335_vm3 = vweird.f32 %v446_v12 }
  0xb1   :  { %v143_v9 = vclz %v142_v1  ;;  %v288_v17 = vadd.s32 1, %v284_v16  ;;  %v164_v45 = vsel %vm595_vm8, 0, %v162_v13 }
  0xb2   :  { %vm287_vm4 = vc.u32 %v262_v8, %v281_v14  ;;  %v286_v58 = vadd.s32 %v281_v14, %v262_v8  ;;  %v181_v56 = vadd.s32 3, %v164_v45 }
  0xb3   :  { %v366_v21 = vadd.s32 4294967294, %v143_v9  ;;  %v289_v22 = vsel %vm287_vm4, %v288_v17, %v284_v16 }
  0xb4   :  { %v290_v35 = vadd.s32 %v289_v22, %v285_v24  ;;  %v182_v14 = vand.u32 3, %v181_v56 }
  0xb5   :  { %vm367_vm5 = vcmp.lt.s32.totalorder %v366_v21, 0 }
  0xb6   :  { %v146_v23 = vsel %vm367_vm5, 0, %v366_v21  ;;  %v291_v27 = vadd.s32 536870912, %v290_v35  ;;  %vm183_vm12 = vcmp.lt.s32.totalorder %v182_v14, 2  ;;  %vm184_vm13 = vcmp.eq.s32.totalorder %v182_v14, 0 }
  0xb7   :  { %v147_v19 = vsub.s32 32, %v146_v23  ;;  %v151_v25 = vsub.s32 4294967266, %v146_v23  ;;  %v148_v28 = vshll.u32 %v139_v0, %v146_v23  ;;  %vm187_vm14 = vcmp.eq.s32.totalorder %v182_v14, 2 }
  0xb8   :  { %v589_v31 = vshrl.u32 %v291_v27, 30 }
  0xb9   :  { %v149_v20 = vshrl.u32 %v131_v18, %v147_v19  ;;  %v152_v29 = vadd.s32 127, %v151_v25 }
  0xba   :  { %v293_v38 = vshll.u32 %v589_v31, 30  ;;  %v316_v25 = vsub.s32 4, %v589_v31 }
  0xbb   :  { %v150_v37 = vor.u32 %v149_v20, %v148_v28  ;;  %v153_v30 = vshll.u32 %v152_v29, 23 }
  0xbc   :  { %v294_v39 = vsub.s32 %v290_v35, %v293_v38 }
  0xbd   :  { %v154_v34 = vor.u32 4788187, %v153_v30  ;;  %v157_v43 = vcvt.s32.f32 %v150_v37  ;;  %v317_v30 = vsel %vm194_vm11, %v316_v25, %v589_v31 }
  0xbe   :  { %vm295_vm6 = vcmp.lt.s32.totalorder %v294_v39, 0  ;;  %v296_v44 = vsub.s32 0, %v294_v39 }
  0xbf   :  { %v155_v41 = vand.u32 2147483647, %v154_v34 }
  0xc0   :  { %v297_v2 = vsel %vm295_vm6, %v296_v44, %v294_v39 }
  0xc1   :  { %v158_v46 = vmul.f32 %v157_v43, %v155_v41  ;;  %v298_v47 = vclz %v297_v2 }
  0xc3   :  { %v159_v51 = vxor.u32 2147483648, %v158_v46  ;;  %v369_v53 = vadd.s32 4294967294, %v298_v47 }
  0xc5   :  { %v160_v52 = vsel %vm39_vm7, %v159_v51, %v158_v46  ;;  %vm370_vm9 = vcmp.lt.s32.totalorder %v369_v53, 0 }
  0xc6   :  { %v163_v54 = vsel %vm595_vm8, %v444_v11, %v160_v52  ;;  %v301_v40 = vsel %vm370_vm9, 0, %v369_v53 }
  0xc7   :  { %v165_v32 = vmul.f32 %v163_v54, %v163_v54  ;;  %v302_v59 = vsub.s32 32, %v301_v40  ;;  %v306_v60 = vsub.s32 4294967266, %v301_v40  ;;  %v303_v0 = vshll.u32 %v294_v39, %v301_v40 }
  0xc8   :  { %v319_v39 = vsel %vm608_vm10, 0, %v317_v30 }
  0xc9   :  { %v166_v55 = vmul.f32 -0.001358992, %v165_v32  ;;  %v173_v57 = vmul.f32 -0.00019511016, %v165_v32  ;;  %v304_v63 = vshrl.u32 %v286_v58, %v302_v59  ;;  %v307_v3 = vadd.s32 127, %v306_v60 }
  0xca   :  { %v336_v11 = vadd.s32 3, %v319_v39 }
  0xcb   :  { %v167_v61 = vadd.f32 0.041655596, %v166_v55  ;;  %v174_v62 = vadd.f32 0.008332121, %v173_v57  ;;  %v305_v50 = vor.u32 %v304_v63, %v303_v0  ;;  %v308_v33 = vshll.u32 %v307_v3, 23 }
  0xcc   :  { %v337_v52 = vand.u32 3, %v336_v11 }
  0xcd   :  { %v168_v4 = vmul.f32 %v167_v61, %v165_v32  ;;  %v175_v5 = vmul.f32 %v174_v62, %v165_v32  ;;  %v309_v6 = vor.u32 4788187, %v308_v33  ;;  %v312_v8 = vcvt.s32.f32 %v305_v50 }
  0xce   :  { %vm339_vm0 = vcmp.eq.s32.totalorder %v337_v52, 0  ;;  %vm342_vm1 = vcmp.eq.s32.totalorder %v337_v52, 2  ;;  %vm338_vm2 = vcmp.lt.s32.totalorder %v337_v52, 2 }
  0xcf   :  { %v169_v48 = vadd.f32 -0.4999988, %v168_v4  ;;  %v176_v36 = vadd.f32 -0.16666654, %v175_v5  ;;  %v310_v26 = vand.u32 2147483647, %v309_v6 }
  0xd1   :  { %v170_v7 = vmul.f32 %v169_v48, %v165_v32  ;;  %v177_v1 = vmul.f32 %v176_v36, %v165_v32  ;;  %v313_v16 = vmul.f32 %v312_v8, %v310_v26 }
  0xd3   :  { %v171_v9 = vadd.f32 1.0, %v170_v7  ;;  %v178_v10 = vadd.f32 1.0, %v177_v1  ;;  %v314_v24 = vxor.u32 2147483648, %v313_v16 }
  0xd5   :  { %v179_v21 = vmul.f32 %v178_v10, %v163_v54  ;;  %v188_v17 = vxor.u32 2147483648, %v171_v9  ;;  %v315_v35 = vsel %vm194_vm11, %v314_v24, %v313_v16 }
  0xd6   :  { %v318_v27 = vsel %vm608_vm10, %v446_v12, %v315_v35 }
  0xd7   :  { %v185_v22 = vxor.u32 2147483648, %v179_v21  ;;  %v189_v19 = vsel %vm187_vm14, %v188_v17, %v179_v21  ;;  %v320_v28 = vmul.f32 %v318_v27, %v318_v27 }
  0xd9   :  { %v186_v18 = vsel %vm184_vm13, %v171_v9, %v185_v22  ;;  %v321_v29 = vmul.f32 -0.001358992, %v320_v28  ;;  %v328_v37 = vmul.f32 -0.00019511016, %v320_v28 }
  0xda   :  { %v190_v15 = vsel %vm183_vm12, %v186_v18, %v189_v19 }
  0xdb   :  { %v191_v20 = vsel %vm180_vm15, nan, %v190_v15  ;;  %v322_v38 = vadd.f32 0.041655596, %v321_v29  ;;  %v329_v34 = vadd.f32 0.008332121, %v328_v37 }
  0xdc   :  { %347 = vst [vmem:[#allocation2] sm:$0xff] %v191_v20 }
  0xdd   :  { %v323_v41 = vmul.f32 %v322_v38, %v320_v28  ;;  %v330_v43 = vmul.f32 %v329_v34, %v320_v28 }
  0xdf   :  { %v324_v44 = vadd.f32 -0.4999988, %v323_v41  ;;  %v331_v46 = vadd.f32 -0.16666654, %v330_v43 }
  0xe1   :  { %v325_v2 = vmul.f32 %v324_v44, %v320_v28  ;;  %v332_v51 = vmul.f32 %v331_v46, %v320_v28 }
  0xe3   :  { %v326_v47 = vadd.f32 1.0, %v325_v2  ;;  %v333_v49 = vadd.f32 1.0, %v332_v51 }
  0xe5   :  { %v334_v53 = vmul.f32 %v333_v49, %v318_v27  ;;  %v343_v42 = vxor.u32 2147483648, %v326_v47 }
  0xe7   :  { %v340_v54 = vxor.u32 2147483648, %v334_v53  ;;  %v344_v32 = vsel %vm342_vm1, %v343_v42, %v334_v53 }
  0xe9   :  { %v341_v31 = vsel %vm339_vm0, %v326_v47, %v340_v54 }
  0xea   :  { %v345_v40 = vsel %vm338_vm2, %v341_v31, %v344_v32 }
  0xeb   :  { %v346_v55 = vsel %vm335_vm3, nan, %v345_v40 }
  0xec   :  { %348 = vst [vmem:[#allocation2 + $0x8] sm:$0xff] %v346_v55 }
  0xed   :  { %359 = dma.vmem_to_hbm [thread:$0]  %s355_s1, 256, %s357_s19, [#allocation3]  }
  0xee   :  { %404 = dma.done.wait [#allocation3], 256  }
  0xef   :  { %405 = vsyncadd [#allocation3], 4294967040 }
  0xf0   :  { %364 = vsyncpa [#allocation3], 1 }

</bundles_post_ra>
